<compile_context>
chip_gen: v5e
topology: v5e:2x2
jax: 0.10.0
libtpu: 0.0.40
codegen_flags: <defaults>
</compile_context>

<pallas_src>
import math
import jax
import jax.numpy as jnp
from jax import lax
from jax.experimental import pallas as pl
from jax.experimental.pallas import tpu as pltpu

NEG_SLOPE = 0.01  # torch.nn.functional.leaky_relu default
LANES = 128

# (Cout, Cin, KH, KW) per layer, and (stride, padding) per layer -- fixed by the module.
LAYER_SHAPES = [(96, 1, 5, 5), (96, 96, 5, 5), (96, 96, 5, 5), (10, 96, 5, 5)]
PARAM_LIST = [(1, 1), (2, 1), (1, 1), (1, 1)]


def _round_up(x, m):
    return ((x + m - 1) // m) * m


# -----------------------------------------------------------------------------
# Pallas kernels
# -----------------------------------------------------------------------------
def _conv_lrelu_kernel(x_ref, w_ref, b_ref, o_ref):
    """One M-tile of leaky_relu(patches @ W + b); bf16 operands, f32 epilogue."""
    acc = jnp.dot(x_ref[...], w_ref[...], preferred_element_type=jnp.float32)
    acc = acc + b_ref[...]
    o_ref[...] = jnp.where(acc >= 0.0, acc, NEG_SLOPE * acc)


def _conv_head_kernel(x_ref, w_ref, b_ref, pool_ref, logit_ref, prob_ref):
    """Layer-4 matmul + bias + leaky_relu fused with avg_pool2d(8) + softmax."""
    acc = jnp.dot(x_ref[...], w_ref[...], preferred_element_type=jnp.float32)
    acc = acc + b_ref[...]
    y = jnp.where(acc >= 0.0, acc, NEG_SLOPE * acc)            # (M, 128) f32
    # avg_pool over each batch's 64 spatial rows: (B, M) @ (M, 128), f32.
    z = jnp.dot(pool_ref[...], y, preferred_element_type=jnp.float32)  # (B, 128)
    logit_ref[...] = z                                         # lanes >= 10 are 0
    lane = lax.broadcasted_iota(jnp.int32, z.shape, 1)
    valid = lane < 10                                          # only 10 classes
    zm = jnp.where(valid, z, -jnp.inf)
    m = jnp.max(zm, axis=-1, keepdims=True)
    e = jnp.where(valid, jnp.exp(zm - m), 0.0)
    prob_ref[...] = e / jnp.sum(e, axis=-1, keepdims=True)


def _div_kernel(mean_ref, prior_ref, noise_ref, o_ref):
    """All divergence reductions in one pass over the packed parameter blobs:
    emits [sum((prior-mean)^2), sum((mean+noise-prior)^2), sum(noise^2)]."""
    m = mean_ref[...]
    p = prior_ref[...]
    n = noise_ref[...]
    d_pm = p - m
    d_np = (m + n) - p
    s_renyi = jnp.sum(d_pm * d_pm)
    s_riva = jnp.sum(d_np * d_np)
    s_noise = jnp.sum(n * n)
    lane = lax.broadcasted_iota(jnp.int32, (1, LANES), 1)
    o_ref[...] = (jnp.where(lane == 0, s_renyi, 0.0)
                  + jnp.where(lane == 1, s_riva, 0.0)
                  + jnp.where(lane == 2, s_noise, 0.0))


# -----------------------------------------------------------------------------
# Pallas wrappers
# -----------------------------------------------------------------------------
def conv_lrelu(patches, w2, bias):
    """(M,K) @ (K,N) + bias -> leaky_relu; M-tiled grid, bf16 MXU operands."""
    M, K = patches.shape
    N = w2.shape[1]
    Np = _round_up(N, LANES)
    tm = min(_round_up(M, 16), 512)          # 16: bf16 sublane packing
    Mp = _round_up(M, tm)
    xp = jnp.pad(patches, ((0, Mp - M), (0, 0))).astype(jnp.bfloat16)
    wp = jnp.pad(w2, ((0, 0), (0, Np - N))).astype(jnp.bfloat16)
    bp = jnp.pad(bias, (0, Np - N)).reshape(1, Np).astype(jnp.float32)
    out = pl.pallas_call(
        _conv_lrelu_kernel,
        out_shape=jax.ShapeDtypeStruct((Mp, Np), jnp.float32),
        grid=(Mp // tm,),
        in_specs=[
            pl.BlockSpec((tm, K), lambda i: (i, 0)),     # K never padded
            pl.BlockSpec((K, Np), lambda i: (0, 0)),
            pl.BlockSpec((1, Np), lambda i: (0, 0)),
        ],
        out_specs=pl.BlockSpec((tm, Np), lambda i: (i, 0)),
        compiler_params=pltpu.CompilerParams(dimension_semantics=("parallel",)),
    )(xp, wp, bp)
    return out[:M, :N]


def conv_head_softmax(patches, w2, bias, batch):
    """Layer-4 conv matmul fused with avg_pool2d(8)+softmax. Returns (logits, probs)."""
    M, K = patches.shape                     # M = batch * 64 (8x8 spatial map)
    N = w2.shape[1]                          # 10 classes
    assert M == batch * 64 and M % 16 == 0
    Np = _round_up(N, LANES)
    xp = patches.astype(jnp.bfloat16)
    wp = jnp.pad(w2, ((0, 0), (0, Np - N))).astype(jnp.bfloat16)
    bp = jnp.pad(bias, (0, Np - N)).reshape(1, Np).astype(jnp.float32)
    # (batch, M) pooling matrix: 1/64 over each batch's 64 spatial rows.
    pool = (jnp.arange(M)[None, :] // 64 == jnp.arange(batch)[:, None]
            ).astype(jnp.float32) / 64.0
    logits, probs = pl.pallas_call(
        _conv_head_kernel,
        out_shape=(jax.ShapeDtypeStruct((batch, Np), jnp.float32),
                   jax.ShapeDtypeStruct((batch, Np), jnp.float32)),
    )(xp, wp, bp, pool)
    return logits[:, :N], probs[:, :N]


def pallas_divergences(means, priors, noises):
    """Single fused reduction over every layer's weights+biases (one launch).
    Returns (sum((prior-mean)^2), sum((mean+noise-prior)^2), sum(noise^2))."""
    def pack(ts):
        v = jnp.concatenate([t.reshape(-1).astype(jnp.float32) for t in ts])
        npad = _round_up(v.shape[0], 8 * LANES)   # zero pad -> sums unchanged
        return jnp.pad(v, (0, npad - v.shape[0])).reshape(npad // LANES, LANES)
    m, p, n = pack(means), pack(priors), pack(noises)
    out = pl.pallas_call(
        _div_kernel,
        out_shape=jax.ShapeDtypeStruct((1, LANES), jnp.float32),
    )(m, p, n)
    return out[0, 0], out[0, 1], out[0, 2]


# -----------------------------------------------------------------------------
# Glue: im2col, parameter init, full forward
# -----------------------------------------------------------------------------
def im2col(x, kh, kw, stride, padding):
    """NHWC input -> (B*Ho*Wo, kh*kw*C) patches (pure layout, no FLOPs)."""
    B, H, W, C = x.shape
    xp = jnp.pad(x, ((0, 0), (padding, padding), (padding, padding), (0, 0)))
    Ho = (H + 2 * padding - kh) // stride + 1
    Wo = (W + 2 * padding - kw) // stride + 1
    cols = []
    for i in range(kh):
        for j in range(kw):
            cols.append(xp[:, i:i + (Ho - 1) * stride + 1:stride,
                           j:j + (Wo - 1) * stride + 1:stride, :])
    pat = jnp.stack(cols, axis=3)            # (B, Ho, Wo, kh*kw, C)
    return pat.reshape(B * Ho * Wo, kh * kw * C), Ho, Wo


def init_params(key):
    """xavier_normal_ weights, uniform(-1/sqrt(fan_in), +) biases; prior = deepcopy."""
    ws, bs = [], []
    for shp in LAYER_SHAPES:
        key, k_w, k_b = jax.random.split(key, 3)
        cout, cin, kh, kw = shp
        fan_in = cin * kh * kw
        fan_out = cout * kh * kw
        std = math.sqrt(2.0 / (fan_in + fan_out))
        ws.append(std * jax.random.normal(k_w, shp, jnp.float32))
        bound = 1.0 / math.sqrt(fan_in)
        bs.append(jax.random.uniform(k_b, (cout,), jnp.float32, -bound, bound))
    return {
        "w": ws, "b": bs,
        "w_prior": [jnp.array(w) for w in ws],
        "b_prior": [jnp.array(b) for b in bs],
    }


def make_noise(key, var):
    """random_linear/random_bias = randn(shape) * sqrt(var)."""
    sq = jnp.sqrt(jnp.float32(var))
    nw, nb = [], []
    for shp in LAYER_SHAPES:
        key, k1, k2 = jax.random.split(key, 3)
        nw.append(jax.random.normal(k1, shp, jnp.float32) * sq)
        nb.append(jax.random.normal(k2, (shp[0],), jnp.float32) * sq)
    return {"w": nw, "b": nb}


def forward(params, noise, x_flat, var=1e-4, alpha=2.0):
    B = x_flat.shape[0]
    s = int(math.sqrt(x_flat.shape[1]))
    x = x_flat.reshape(B, s, s, 1)           # NHWC

    logits = probs = None
    n_layers = len(LAYER_SHAPES)
    for i in range(n_layers):
        w = params["w"][i] + noise["w"][i]   # sampled conv weight
        b = params["b"][i] + noise["b"][i]   # sampled conv bias
        stride, pad = PARAM_LIST[i]
        cout, cin = LAYER_SHAPES[i][0], LAYER_SHAPES[i][1]
        patches, Ho, Wo = im2col(x, 5, 5, stride, pad)
        # TODO(synk): padded w2/bias repack could be cached across calls when
        # the same noise sample is reused ('keep'); here it is per call.
        w2 = jnp.transpose(w, (2, 3, 1, 0)).reshape(25 * cin, cout)
        if i < n_layers - 1:
            y = conv_lrelu(patches, w2, b)   # fused conv + bias + leaky_relu
            x = y.reshape(B, Ho, Wo, cout)
        else:
            # avg_pool2d(kernel=8) on the 8x8 map + softmax, fused in the kernel.
            assert Ho * Wo == 64, "module hard-codes avg_pool2d(kernel=8) on 8x8"
            logits, probs = conv_head_softmax(patches, w2, b, B)

    # Fused divergence reductions over all layers: one kernel launch reads each
    # parameter tensor exactly once.  NOTE: the renyi sum depends only on
    # (mean, prior) and could be cached across forward calls by the caller; it
    # is free here since this kernel already streams mean/prior for rivasplata.
    means = list(params["w"]) + list(params["b"])
    priors = list(params["w_prior"]) + list(params["b_prior"])
    noises = list(noise["w"]) + list(noise["b"])
    s_renyi, s_riva, s_noise = pallas_divergences(means, priors, noises)

    pred = jnp.argmax(logits, axis=1)[:, None]
    var = jnp.float32(var)
    d_renyi = alpha / 2.0 * (s_renyi / var)
    d_kl = 0.5 * d_renyi
    d_riva = 0.5 / var * (s_riva - s_noise)
    return {"out": probs, "pred": pred,
            "div_renyi": d_renyi, "div_kl": d_kl, "div_rivasplata": d_riva}


if __name__ == "__main__":
    # Input must be (B, 784): the module hard-codes avg_pool2d(x, 8), which
    # requires a 28x28 image through this exact conv stack.  Batch kept small.
    key = jax.random.PRNGKey(0)
    k_x, k_p, k_n = jax.random.split(key, 3)
    B, D = 2, 28 * 28
    var = 1e-4
    x = jax.random.normal(k_x, (B, D), jnp.float32)
    params = init_params(k_p)
    noise = make_noise(k_n, var)   # 'keep' caching of noise == reusing this dict across calls

    result = forward(params, noise, x, var=var, alpha=2.0)
    result = jax.block_until_ready(result)

    assert result["out"].shape == (B, 10)
    assert result["pred"].shape == (B, 1)
    print("KERNEL_OK")
</pallas_src>

<mosaic_0001>
module attributes {stable_mosaic.version = 11 : i64} {
  func.func @_conv_lrelu_kernel(%arg0: i32, %arg1: memref<512x25xbf16, #tpu.memory_space<vmem>>, %arg2: memref<25x128xbf16, #tpu.memory_space<vmem>>, %arg3: memref<1x128xf32, #tpu.memory_space<vmem>>, %arg4: memref<512x128xf32, #tpu.memory_space<vmem>>) attributes {dimension_semantics = [#tpu.dimension_semantics<parallel>], iteration_bounds = array<i64: 3>, scalar_prefetch = 0 : i64, scratch_operands = 0 : i64, tpu.core_type = #tpu.core_type<tc>, window_params = [{transform_indices = @transform_0, window_bounds = array<i64: 512, 25>}, {pipeline_mode = #tpu.pipeline_mode<synchronous>, transform_indices = @transform_1, window_bounds = array<i64: 25, 128>}, {pipeline_mode = #tpu.pipeline_mode<synchronous>, transform_indices = @transform_2, window_bounds = array<i64: 1, 128>}, {transform_indices = @transform_3, window_bounds = array<i64: 512, 128>}]} {
    %c0 = arith.constant 0 : index
    %c0_0 = arith.constant 0 : index
    %0 = vector.load %arg1[%c0, %c0_0] : memref<512x25xbf16, #tpu.memory_space<vmem>>, vector<512x25xbf16>
    %c0_1 = arith.constant 0 : index
    %c0_2 = arith.constant 0 : index
    %1 = vector.load %arg2[%c0_1, %c0_2] : memref<25x128xbf16, #tpu.memory_space<vmem>>, vector<25x128xbf16>
    %cst = arith.constant dense<0.000000e+00> : vector<512x128xf32>
    %2 = tpu.matmul %0, %1, %cst {dimension_numbers = #tpu.dot_dimension_numbers<[1], [0], [0], [1], [0, 0, 1, 1], [], []>} : vector<512x25xbf16>, vector<25x128xbf16>, vector<512x128xf32> -> vector<512x128xf32>
    %c0_3 = arith.constant 0 : index
    %c0_4 = arith.constant 0 : index
    %3 = vector.load %arg3[%c0_3, %c0_4] : memref<1x128xf32, #tpu.memory_space<vmem>>, vector<1x128xf32>
    %4 = vector.broadcast %3 : vector<1x128xf32> to vector<512x128xf32>
    %5 = arith.addf %2, %4 : vector<512x128xf32>
    %cst_5 = arith.constant 0.000000e+00 : f32
    %6 = vector.broadcast %cst_5 : f32 to vector<512x128xf32>
    %7 = arith.cmpf oge, %5, %6 : vector<512x128xf32>
    %cst_6 = arith.constant 0.00999999977 : f32
    %8 = vector.broadcast %cst_6 : f32 to vector<512x128xf32>
    %9 = arith.mulf %8, %5 : vector<512x128xf32>
    %10 = arith.select %7, %5, %9 : vector<512x128xi1>, vector<512x128xf32>
    %c0_7 = arith.constant 0 : index
    %c0_8 = arith.constant 0 : index
    %11 = vector.load %arg4[%c0_7, %c0_8] : memref<512x128xf32, #tpu.memory_space<vmem>>, vector<512x128xf32>
    tpu.vector_store %arg4[%c0_7, %c0_8], %10 {strides = array<i32>} : memref<512x128xf32, #tpu.memory_space<vmem>>, vector<512x128xf32>,
    return
  }
  func.func @transform_0(%arg0: i32) -> (i32, i32) {
    %c0_i32 = arith.constant 0 : i32
    %c0_i32_0 = arith.constant 0 : i32
    return %arg0, %c0_i32 : i32, i32
  }
  func.func @transform_1(%arg0: i32) -> (i32, i32) {
    %c0_i32 = arith.constant 0 : i32
    %c0_i32_0 = arith.constant 0 : i32
    %c0_i32_1 = arith.constant 0 : i32
    return %c0_i32, %c0_i32_0 : i32, i32
  }
  func.func @transform_2(%arg0: i32) -> (i32, i32) {
    %c0_i32 = arith.constant 0 : i32
    %c0_i32_0 = arith.constant 0 : i32
    %c0_i32_1 = arith.constant 0 : i32
    return %c0_i32, %c0_i32_0 : i32, i32
  }
  func.func @transform_3(%arg0: i32) -> (i32, i32) {
    %c0_i32 = arith.constant 0 : i32
    %c0_i32_0 = arith.constant 0 : i32
    return %arg0, %c0_i32 : i32, i32
  }
}

</mosaic_0001>

<bundles_post_ra>
// kernel: tpu_custom_call.1
= control target key start
LH: loop header
LB: loop body
LE: loop exit
PB: predicated region body
PF: predicated region fallthrough
CT: control target
= control target key end

     0   :  { %8 = vsyncpa [#allocation3], 0  ;;  %s1673_s0 = inlined_call_operand.vmem [shape: bf16[1536,25], index: 0, kind: input, shape index: {}]   ;;  %s1674_s1 = inlined_call_operand.vmem [shape: bf16[25,128], index: 1, kind: input, shape index: {}]   ;;  %s1675_s2 = inlined_call_operand.vmem [shape: f32[1,128], index: 2, kind: input, shape index: {}]   ;;  %s1676_s3 = inlined_call_operand.hbm [shape: f32[1536,128], index: 3, kind: output, shape index: {}]  }
   0x1   :  { %10 = vsyncpa [#allocation3 + $0x1], 0  ;;  %s1374_s12 = smov 0   ;;  %s1376_s13 = smov 0  }
   0x2   :  { %s1378_s14 = smov 0   ;;  %s1380_s15 = smov 0  }
   0x3 LB: > { %s1395_s16 = sadd.s32 4294967295, %s1349_s15   ;;  %s1023_s17 = sadd.s32 4294967294, %s1349_s15   ;;  %s1349_s15 = sphi %s1380_s15, %s1682_s15   ;;  %s1345_s14 = sphi %s1378_s14, %s1681_s14   ;;  %s1341_s13 = sphi %s1376_s13, %s1680_s13   ;;  %s1337_s12 = sphi %s1374_s12, %s1679_s12  }
   0x4   : > { %s1399_s18 = sadd.s32 1, %s1349_s15   ;;  %s91_s19 = sadd.s32 1, %s1345_s14 }
   0x5   : > { %s88_s20 = ssub.s32 %s1349_s15, %s1399_s18  ;;  %p101_p0 = scmp.ne.s32.totalorder %s1345_s14, %s1341_s13 }
   0x6   : > { %p89_p1 = scmp.eq.s32.totalorder %s88_s20, 0  ;;  %p102_p2 = scmp.eq.s32.totalorder %s1395_s16, 2 }
   0x7   : > { %p107_p3 = scmp.ne.s32.totalorder %s1341_s13, %s1337_s12  ;;  %p108_p4 = scmp.eq.s32.totalorder %s1023_s17, 2 }
   0x8   : > { %s1410_s21 = scalar_select %p89_p1, %s1345_s14, %s91_s19  }
   0x9   : > { %p1412_p5 = por %p102_p2, %p101_p0  ;;  %p1416_p6 = por %p108_p4, %p107_p3 }
   0xa   : > { %p1026_p7 = scmp.ge.s32.totalorder %s1349_s15, 1  ;;  %p141_p8 = scmp.lt.s32.totalorder %s1349_s15, 4 }
   0xc   : > { %p142_p9 = pnand %p1026_p7, %p141_p8 }
   0xd   : > { %s1028_s28 = sshll.u32 (!%p142_p9), %s1395_s16, 6  ;;  %s162_s8 = sand.u32 (!%p142_p9), 1, %s1341_s13  }
   0xe   : > { %145 = sbr.rel (%p142_p9) target bundleno = 295 (0x127), region = 32  ;;  %p166_p10 = scmp.lt.s32.totalorder (!%p142_p9), %s1028_s28, 191 }
   0xf   : > { %s1027_s11 = sshll.u32 (!%p142_p9), %s162_s8, 9  ;;  %s1237_s19 = sshll.u32 (!%p142_p9), %s1395_s16, 9 }
  0x10   : > { %s1511_s17 = scalar_lea.vmem (!%p142_p9), [#allocation2], %s1027_s11  ;;  %s957_s16 = scalar_lea.hbm (!%p142_p9), %s1676_s3, %s1237_s19 }
  0x11   : > { %s958_s25 = sshll.u32 (!%p142_p9), %s1511_s17, 4  ;;  %s960_s26 = sshll.u32 (!%p142_p9), %s957_s16, 4  ;;  %s959_s25 = int_to_ptr.vmem [resolvable:$true] %s958_s25  ;;  %s961_s26 = int_to_ptr.hbm [resolvable:$true] %s960_s26 }
  0x12   : > { %s946_s27 = scalar_lea.sflag (!%p142_p9), [#allocation3], %s162_s8  ;;  %s1307_s5 = scalar_lea.hbm (!%p142_p9), %s1676_s3, 1536 }
  0x13   : > { %v1164_v0 = vld [vmem:[%s1674_s1 + $0x8] sm:$0xf]  ;;  %v1236_v1 = vld [vmem:[%s1674_s1 + $0x8] sm:$0x10]  ;;  %vm513_vm0 = vcmask 1043456   ;;  %vm514_vm1 = vcmask 1044480  }
  0x14   : > { %v1165_v2 = vor.u32 %v1236_v1, %v1164_v0  ;;  %v1351_v3 = vmov 65535   ;;  %s1684_s28 = smov (!%p166_p10, %s1028_s28), 191  ;;  %v1235_v7 = vld [vmem:[%s1674_s1] sm:$0xff]  ;;  %vm416_vm2 = vcmask 203776  }
  0x15   : > { %v515_v4 = vsel %vm513_vm0, 4294967295, %v1351_v3  ;;  %s1029_s4 = sshll.u32 %s1684_s28, 2  ;;  %v1505_v40 = vld [vmem:[%s1675_s2] ss:$0 sm:$0xff]  ;;  %s1301_s28 = sshra.s32 %s961_s26, 4  ;;  %s1302_s28 = int_to_ptr.hbm [resolvable:$true] %s1301_s28 }
  0x16   : > { %v516_v5 = vsel %vm514_vm1, %v515_v4, 0  ;;  %s1435_s7 = scalar_lea.vmem %s1673_s0, %s1029_s4  ;;  %s1303_s29 = scalar_lea.hbm %s1302_s28, 512 }
  0x17   : > { %v518_v6 = vand.u32 %v1165_v2, %v516_v5  ;;  %v1203_v8 = vld [vmem:[%s1435_s7] sm:$0xff]  ;;  %v1204_v12 = vld [vmem:[%s1435_s7 + $0x8] sm:$0xff]  ;;  %v1205_v16 = vld [vmem:[%s1435_s7 + $0x10] sm:$0xff]  ;;  %p1304_p11 = scmp.ne.s32.totalorder %s1302_s28, %s1303_s29  ;;  %p1308_p0 = scmp.lt.s32.totalorder %s1302_s28, %s1676_s3 }
  0x18   : > { %v1211_v9 = vld [vmem:[%s1435_s7 + $0x40] sm:$0xff]  ;;  %v1212_v13 = vld [vmem:[%s1435_s7 + $0x48] sm:$0xff]  ;;  %v1213_v17 = vld [vmem:[%s1435_s7 + $0x50] sm:$0xff]  ;;  %p1309_p1 = scmp.lt.s32.totalorder %s1307_s5, %s1303_s29 }
  0x19   : > { %526 = vmatpush.bf16.msra.mxu0 %v518_v6  ;;  %1238 = vmatpush.bf16.msra.mxu1 %v518_v6  ;;  %v1219_v10 = vld [vmem:[%s1435_s7 + $0x80] sm:$0xff]  ;;  %v1220_v14 = vld [vmem:[%s1435_s7 + $0x88] sm:$0xff]  ;;  %v1221_v18 = vld [vmem:[%s1435_s7 + $0x90] sm:$0xff]  ;;  %p1305_p12 = pnand %p1304_p11, %p1412_p5 }
  0x1a   : > { %1239 = vmatpush.bf16.msra.mxu2 %v518_v6  ;;  %1240 = vmatpush.bf16.msra.mxu3 %v518_v6  ;;  %v1227_v11 = vld [vmem:[%s1435_s7 + $0xc0] sm:$0xff]  ;;  %v1228_v15 = vld [vmem:[%s1435_s7 + $0xc8] sm:$0xff]  ;;  %v1229_v19 = vld [vmem:[%s1435_s7 + $0xd0] sm:$0xff]  ;;  %p1310_p2 = por %p1309_p1, %p1308_p0 }
  0x1b   : > { %v1206_v20 = vld [vmem:[%s1435_s7 + $0x18] sm:$0xff]  ;;  %v1207_v24 = vld [vmem:[%s1435_s7 + $0x20] sm:$0xff]  ;;  %v1208_v28 = vld [vmem:[%s1435_s7 + $0x28] sm:$0xff]  ;;  %p1306_p13 = pneg %p1305_p12 }
  0x1c   : > { %v1214_v21 = vld [vmem:[%s1435_s7 + $0x58] sm:$0xff]  ;;  %v1215_v25 = vld [vmem:[%s1435_s7 + $0x60] sm:$0xff]  ;;  %v1216_v29 = vld [vmem:[%s1435_s7 + $0x68] sm:$0xff] }
  0x1d   : > { %527 = vmatpush.bf16.msra.mxu0 %v1235_v7  ;;  %1241 = vmatpush.bf16.msra.mxu1 %v1235_v7  ;;  %v1222_v22 = vld [vmem:[%s1435_s7 + $0x98] sm:$0xff]  ;;  %v1223_v26 = vld [vmem:[%s1435_s7 + $0xa0] sm:$0xff]  ;;  %v1224_v30 = vld [vmem:[%s1435_s7 + $0xa8] sm:$0xff]  ;;  %p1311_p3 = pnand %p1310_p2, %p1306_p13 }
  0x1e   : > { %1242 = vmatpush.bf16.msra.mxu2 %v1235_v7  ;;  %1243 = vmatpush.bf16.msra.mxu3 %v1235_v7  ;;  %v1230_v23 = vld [vmem:[%s1435_s7 + $0xd8] sm:$0xff]  ;;  %v1231_v27 = vld [vmem:[%s1435_s7 + $0xe0] sm:$0xff]  ;;  %v1232_v31 = vld [vmem:[%s1435_s7 + $0xe8] sm:$0xff] }
  0x1f   : > { %v1209_v32 = vld [vmem:[%s1435_s7 + $0x30] sm:$0xff]  ;;  %v1210_v36 = vld [vmem:[%s1435_s7 + $0x38] sm:$0xff] }
  0x20   : > { %1166 = vmatmul.msk.bf16.vlgmr.msra.gmra.mxu0 %vm416_vm2, %v1203_v8  ;;  %1174 = vmatmul.msk.bf16.vlgmr.msra.gmra.mxu1 %vm416_vm2, %v1211_v9  ;;  %v1217_v33 = vld [vmem:[%s1435_s7 + $0x70] sm:$0xff]  ;;  %v1218_v37 = vld [vmem:[%s1435_s7 + $0x78] sm:$0xff] }
  0x21   : > { %1182 = vmatmul.msk.bf16.vlgmr.msra.gmra.mxu2 %vm416_vm2, %v1219_v10  ;;  %1190 = vmatmul.msk.bf16.vlgmr.msra.gmra.mxu3 %vm416_vm2, %v1227_v11  ;;  %v1225_v34 = vld [vmem:[%s1435_s7 + $0xb0] sm:$0xff]  ;;  %v1226_v38 = vld [vmem:[%s1435_s7 + $0xb8] sm:$0xff] }
  0x22   : > { %v1233_v35 = vld [vmem:[%s1435_s7 + $0xf0] sm:$0xff]  ;;  %v1234_v39 = vld [vmem:[%s1435_s7 + $0xf8] sm:$0xff] }
  0x30   : > { %1167 = vmatmul.msk.bf16.gmra.mxu0 %vm416_vm2, %v1204_v12  ;;  %1175 = vmatmul.msk.bf16.gmra.mxu1 %vm416_vm2, %v1212_v13 }
  0x31   : > { %1183 = vmatmul.msk.bf16.gmra.mxu2 %vm416_vm2, %v1220_v14  ;;  %1191 = vmatmul.msk.bf16.gmra.mxu3 %vm416_vm2, %v1228_v15 }
  0x40   : > { %1168 = vmatmul.msk.bf16.gmra.mxu0 %vm416_vm2, %v1205_v16  ;;  %1176 = vmatmul.msk.bf16.gmra.mxu1 %vm416_vm2, %v1213_v17 }
  0x41   : > { %1184 = vmatmul.msk.bf16.gmra.mxu2 %vm416_vm2, %v1221_v18  ;;  %1192 = vmatmul.msk.bf16.gmra.mxu3 %vm416_vm2, %v1229_v19 }
  0x50   : > { %1169 = vmatmul.msk.bf16.gmra.mxu0 %vm416_vm2, %v1206_v20  ;;  %1177 = vmatmul.msk.bf16.gmra.mxu1 %vm416_vm2, %v1214_v21 }
  0x51   : > { %1185 = vmatmul.msk.bf16.gmra.mxu2 %vm416_vm2, %v1222_v22  ;;  %1193 = vmatmul.msk.bf16.gmra.mxu3 %vm416_vm2, %v1230_v23 }
  0x60   : > { %1170 = vmatmul.msk.bf16.gmra.mxu0 %vm416_vm2, %v1207_v24  ;;  %1178 = vmatmul.msk.bf16.gmra.mxu1 %vm416_vm2, %v1215_v25 }
  0x61   : > { %1186 = vmatmul.msk.bf16.gmra.mxu2 %vm416_vm2, %v1223_v26  ;;  %1194 = vmatmul.msk.bf16.gmra.mxu3 %vm416_vm2, %v1231_v27 }
  0x70   : > { %1171 = vmatmul.msk.bf16.gmra.mxu0 %vm416_vm2, %v1208_v28  ;;  %1179 = vmatmul.msk.bf16.gmra.mxu1 %vm416_vm2, %v1216_v29 }
  0x71   : > { %1187 = vmatmul.msk.bf16.gmra.mxu2 %vm416_vm2, %v1224_v30  ;;  %1195 = vmatmul.msk.bf16.gmra.mxu3 %vm416_vm2, %v1232_v31 }
  0x80   : > { %1172 = vmatmul.msk.bf16.gmra.mxu0 %vm416_vm2, %v1209_v32  ;;  %1180 = vmatmul.msk.bf16.gmra.mxu1 %vm416_vm2, %v1217_v33 }
  0x81   : > { %1188 = vmatmul.msk.bf16.gmra.mxu2 %vm416_vm2, %v1225_v34  ;;  %1196 = vmatmul.msk.bf16.gmra.mxu3 %vm416_vm2, %v1233_v35 }
  0x90   : > { %1173 = vmatmul.msk.bf16.gmra.mxu0 %vm416_vm2, %v1210_v36  ;;  %1181 = vmatmul.msk.bf16.gmra.mxu1 %vm416_vm2, %v1218_v37 }
  0x91   : > { %1189 = vmatmul.msk.bf16.gmra.mxu2 %vm416_vm2, %v1226_v38  ;;  %1197 = vmatmul.msk.bf16.gmra.mxu3 %vm416_vm2, %v1234_v39 }
  0x9d   : > { %v529_v41 = vpop.f32.mrf.mxu0  ;;  %v569_v42 = vpop.f32.mrf.mxu1 }
  0x9e   : > { %v530_v43 = vadd.f32 %v1505_v40, %v529_v41  ;;  %v570_v44 = vadd.f32 %v1505_v40, %v569_v42 }
  0xa0   : > { %vm689_vm3 = vcmp.ge.f32.partialorder %v530_v43, 0.0  ;;  %v753_v45 = vmul.f32 0.01, %v530_v43  ;;  %vm705_vm4 = vcmp.ge.f32.partialorder %v570_v44, 0.0  ;;  %v769_v46 = vmul.f32 0.01, %v570_v44 }
  0xa2   : > { %v817_v47 = vsel %vm689_vm3, %v530_v43, %v753_v45  ;;  %v833_v48 = vsel %vm705_vm4, %v570_v44, %v769_v46 }
  0xa3   : > { %881 = vst [vmem:[%s1511_s17] sm:$0xff] %v817_v47 }
  0xa4   : > { %897 = vst [vmem:[%s1511_s17 + $0x80] sm:$0xff] %v833_v48  ;;  %v609_v49 = vpop.f32.mrf.mxu2  ;;  %v649_v50 = vpop.f32.mrf.mxu3 }
  0xa5   : > { %v610_v51 = vadd.f32 %v1505_v40, %v609_v49  ;;  %v650_v52 = vadd.f32 %v1505_v40, %v649_v50  ;;  %v531_v53 = vpop.f32.mrf.mxu0  ;;  %v571_v54 = vpop.f32.mrf.mxu1 }
  0xa6   : > { %v532_v55 = vadd.f32 %v1505_v40, %v531_v53  ;;  %v572_v56 = vadd.f32 %v1505_v40, %v571_v54 }
  0xa7   : > { %vm721_vm5 = vcmp.ge.f32.partialorder %v610_v51, 0.0  ;;  %v785_v57 = vmul.f32 0.01, %v610_v51  ;;  %vm737_vm6 = vcmp.ge.f32.partialorder %v650_v52, 0.0  ;;  %v801_v58 = vmul.f32 0.01, %v650_v52 }
  0xa8   : > { %vm690_vm7 = vcmp.ge.f32.partialorder %v532_v55, 0.0  ;;  %v754_v59 = vmul.f32 0.01, %v532_v55  ;;  %vm706_vm8 = vcmp.ge.f32.partialorder %v572_v56, 0.0  ;;  %v770_v60 = vmul.f32 0.01, %v572_v56 }
  0xa9   : > { %v849_v61 = vsel %vm721_vm5, %v610_v51, %v785_v57  ;;  %v865_v62 = vsel %vm737_vm6, %v650_v52, %v801_v58 }
  0xaa   : > { %913 = vst [vmem:[%s1511_s17 + $0x100] sm:$0xff] %v849_v61  ;;  %v818_v63 = vsel %vm690_vm7, %v532_v55, %v754_v59  ;;  %v834_v0 = vsel %vm706_vm8, %v572_v56, %v770_v60 }
  0xab   : > { %929 = vst [vmem:[%s1511_s17 + $0x180] sm:$0xff] %v865_v62 }
  0xac   : > { %882 = vst [vmem:[%s1511_s17 + $0x8] sm:$0xff] %v818_v63  ;;  %v611_v1 = vpop.f32.mrf.mxu2  ;;  %v651_v2 = vpop.f32.mrf.mxu3 }
  0xad   : > { %898 = vst [vmem:[%s1511_s17 + $0x88] sm:$0xff] %v834_v0  ;;  %v612_v3 = vadd.f32 %v1505_v40, %v611_v1  ;;  %v652_v4 = vadd.f32 %v1505_v40, %v651_v2  ;;  %v534_v5 = vpop.f32.mrf.mxu0  ;;  %v574_v6 = vpop.f32.mrf.mxu1 }
  0xae   : > { %v535_v7 = vadd.f32 %v1505_v40, %v534_v5  ;;  %v575_v8 = vadd.f32 %v1505_v40, %v574_v6 }
  0xaf   : > { %vm722_vm9 = vcmp.ge.f32.partialorder %v612_v3, 0.0  ;;  %v786_v9 = vmul.f32 0.01, %v612_v3  ;;  %vm738_vm10 = vcmp.ge.f32.partialorder %v652_v4, 0.0  ;;  %v802_v10 = vmul.f32 0.01, %v652_v4 }
  0xb0   : > { %vm691_vm11 = vcmp.ge.f32.partialorder %v535_v7, 0.0  ;;  %v755_v11 = vmul.f32 0.01, %v535_v7  ;;  %vm707_vm12 = vcmp.ge.f32.partialorder %v575_v8, 0.0  ;;  %v771_v12 = vmul.f32 0.01, %v575_v8 }
  0xb1   : > { %v850_v13 = vsel %vm722_vm9, %v612_v3, %v786_v9  ;;  %v866_v14 = vsel %vm738_vm10, %v652_v4, %v802_v10 }
  0xb2   : > { %914 = vst [vmem:[%s1511_s17 + $0x108] sm:$0xff] %v850_v13  ;;  %v819_v15 = vsel %vm691_vm11, %v535_v7, %v755_v11  ;;  %v835_v16 = vsel %vm707_vm12, %v575_v8, %v771_v12 }
  0xb3   : > { %930 = vst [vmem:[%s1511_s17 + $0x188] sm:$0xff] %v866_v14 }
  0xb4   : > { %883 = vst [vmem:[%s1511_s17 + $0x10] sm:$0xff] %v819_v15  ;;  %v614_v17 = vpop.f32.mrf.mxu2  ;;  %v654_v18 = vpop.f32.mrf.mxu3 }
  0xb5   : > { %899 = vst [vmem:[%s1511_s17 + $0x90] sm:$0xff] %v835_v16  ;;  %v615_v19 = vadd.f32 %v1505_v40, %v614_v17  ;;  %v655_v20 = vadd.f32 %v1505_v40, %v654_v18  ;;  %v536_v21 = vpop.f32.mrf.mxu0  ;;  %v576_v22 = vpop.f32.mrf.mxu1 }
  0xb6   : > { %v537_v23 = vadd.f32 %v1505_v40, %v536_v21  ;;  %v577_v24 = vadd.f32 %v1505_v40, %v576_v22 }
  0xb7   : > { %vm723_vm13 = vcmp.ge.f32.partialorder %v615_v19, 0.0  ;;  %v787_v25 = vmul.f32 0.01, %v615_v19  ;;  %vm739_vm14 = vcmp.ge.f32.partialorder %v655_v20, 0.0  ;;  %v803_v26 = vmul.f32 0.01, %v655_v20 }
  0xb8   : > { %vm692_vm15 = vcmp.ge.f32.partialorder %v537_v23, 0.0  ;;  %v756_v27 = vmul.f32 0.01, %v537_v23  ;;  %vm708_vm0 = vcmp.ge.f32.partialorder %v577_v24, 0.0  ;;  %v772_v28 = vmul.f32 0.01, %v577_v24 }
  0xb9   : > { %v851_v29 = vsel %vm723_vm13, %v615_v19, %v787_v25  ;;  %v867_v30 = vsel %vm739_vm14, %v655_v20, %v803_v26 }
  0xba   : > { %915 = vst [vmem:[%s1511_s17 + $0x110] sm:$0xff] %v851_v29  ;;  %v820_v31 = vsel %vm692_vm15, %v537_v23, %v756_v27  ;;  %v836_v32 = vsel %vm708_vm0, %v577_v24, %v772_v28 }
  0xbb   : > { %931 = vst [vmem:[%s1511_s17 + $0x190] sm:$0xff] %v867_v30 }
  0xbc   : > { %884 = vst [vmem:[%s1511_s17 + $0x18] sm:$0xff] %v820_v31  ;;  %v616_v33 = vpop.f32.mrf.mxu2  ;;  %v656_v34 = vpop.f32.mrf.mxu3 }
  0xbd   : > { %900 = vst [vmem:[%s1511_s17 + $0x98] sm:$0xff] %v836_v32  ;;  %v617_v35 = vadd.f32 %v1505_v40, %v616_v33  ;;  %v657_v36 = vadd.f32 %v1505_v40, %v656_v34  ;;  %v539_v37 = vpop.f32.mrf.mxu0  ;;  %v579_v38 = vpop.f32.mrf.mxu1 }
  0xbe   : > { %v540_v39 = vadd.f32 %v1505_v40, %v539_v37  ;;  %v580_v41 = vadd.f32 %v1505_v40, %v579_v38 }
  0xbf   : > { %vm724_vm1 = vcmp.ge.f32.partialorder %v617_v35, 0.0  ;;  %v788_v42 = vmul.f32 0.01, %v617_v35  ;;  %vm740_vm2 = vcmp.ge.f32.partialorder %v657_v36, 0.0  ;;  %v804_v43 = vmul.f32 0.01, %v657_v36 }
  0xc0   : > { %vm693_vm3 = vcmp.ge.f32.partialorder %v540_v39, 0.0  ;;  %v757_v44 = vmul.f32 0.01, %v540_v39  ;;  %vm709_vm4 = vcmp.ge.f32.partialorder %v580_v41, 0.0  ;;  %v773_v45 = vmul.f32 0.01, %v580_v41 }
  0xc1   : > { %v852_v46 = vsel %vm724_vm1, %v617_v35, %v788_v42  ;;  %v868_v47 = vsel %vm740_vm2, %v657_v36, %v804_v43 }
  0xc2   : > { %916 = vst [vmem:[%s1511_s17 + $0x118] sm:$0xff] %v852_v46  ;;  %v821_v48 = vsel %vm693_vm3, %v540_v39, %v757_v44  ;;  %v837_v49 = vsel %vm709_vm4, %v580_v41, %v773_v45 }
  0xc3   : > { %932 = vst [vmem:[%s1511_s17 + $0x198] sm:$0xff] %v868_v47 }
  0xc4   : > { %885 = vst [vmem:[%s1511_s17 + $0x20] sm:$0xff] %v821_v48  ;;  %v619_v50 = vpop.f32.mrf.mxu2  ;;  %v659_v51 = vpop.f32.mrf.mxu3 }
  0xc5   : > { %901 = vst [vmem:[%s1511_s17 + $0xa0] sm:$0xff] %v837_v49  ;;  %v620_v52 = vadd.f32 %v1505_v40, %v619_v50  ;;  %v660_v53 = vadd.f32 %v1505_v40, %v659_v51  ;;  %v541_v54 = vpop.f32.mrf.mxu0  ;;  %v581_v55 = vpop.f32.mrf.mxu1 }
  0xc6   : > { %v542_v56 = vadd.f32 %v1505_v40, %v541_v54  ;;  %v582_v57 = vadd.f32 %v1505_v40, %v581_v55 }
  0xc7   : > { %vm725_vm5 = vcmp.ge.f32.partialorder %v620_v52, 0.0  ;;  %v789_v58 = vmul.f32 0.01, %v620_v52  ;;  %vm741_vm6 = vcmp.ge.f32.partialorder %v660_v53, 0.0  ;;  %v805_v59 = vmul.f32 0.01, %v660_v53 }
  0xc8   : > { %vm694_vm7 = vcmp.ge.f32.partialorder %v542_v56, 0.0  ;;  %v758_v60 = vmul.f32 0.01, %v542_v56  ;;  %vm710_vm8 = vcmp.ge.f32.partialorder %v582_v57, 0.0  ;;  %v774_v61 = vmul.f32 0.01, %v582_v57 }
  0xc9   : > { %v853_v62 = vsel %vm725_vm5, %v620_v52, %v789_v58  ;;  %v869_v63 = vsel %vm741_vm6, %v660_v53, %v805_v59 }
  0xca   : > { %917 = vst [vmem:[%s1511_s17 + $0x120] sm:$0xff] %v853_v62  ;;  %v822_v0 = vsel %vm694_vm7, %v542_v56, %v758_v60  ;;  %v838_v1 = vsel %vm710_vm8, %v582_v57, %v774_v61 }
  0xcb   : > { %933 = vst [vmem:[%s1511_s17 + $0x1a0] sm:$0xff] %v869_v63 }
  0xcc   : > { %886 = vst [vmem:[%s1511_s17 + $0x28] sm:$0xff] %v822_v0  ;;  %v621_v2 = vpop.f32.mrf.mxu2  ;;  %v661_v3 = vpop.f32.mrf.mxu3 }
  0xcd   : > { %902 = vst [vmem:[%s1511_s17 + $0xa8] sm:$0xff] %v838_v1  ;;  %v622_v4 = vadd.f32 %v1505_v40, %v621_v2  ;;  %v662_v5 = vadd.f32 %v1505_v40, %v661_v3  ;;  %v544_v6 = vpop.f32.mrf.mxu0  ;;  %v584_v7 = vpop.f32.mrf.mxu1 }
  0xce   : > { %v545_v8 = vadd.f32 %v1505_v40, %v544_v6  ;;  %v585_v9 = vadd.f32 %v1505_v40, %v584_v7 }
  0xcf   : > { %vm726_vm9 = vcmp.ge.f32.partialorder %v622_v4, 0.0  ;;  %v790_v10 = vmul.f32 0.01, %v622_v4  ;;  %vm742_vm10 = vcmp.ge.f32.partialorder %v662_v5, 0.0  ;;  %v806_v11 = vmul.f32 0.01, %v662_v5 }
  0xd0   : > { %vm695_vm11 = vcmp.ge.f32.partialorder %v545_v8, 0.0  ;;  %v759_v12 = vmul.f32 0.01, %v545_v8  ;;  %vm711_vm12 = vcmp.ge.f32.partialorder %v585_v9, 0.0  ;;  %v775_v13 = vmul.f32 0.01, %v585_v9 }
  0xd1   : > { %v854_v14 = vsel %vm726_vm9, %v622_v4, %v790_v10  ;;  %v870_v15 = vsel %vm742_vm10, %v662_v5, %v806_v11 }
  0xd2   : > { %918 = vst [vmem:[%s1511_s17 + $0x128] sm:$0xff] %v854_v14  ;;  %v823_v16 = vsel %vm695_vm11, %v545_v8, %v759_v12  ;;  %v839_v17 = vsel %vm711_vm12, %v585_v9, %v775_v13 }
  0xd3   : > { %934 = vst [vmem:[%s1511_s17 + $0x1a8] sm:$0xff] %v870_v15 }
  0xd4   : > { %887 = vst [vmem:[%s1511_s17 + $0x30] sm:$0xff] %v823_v16  ;;  %v624_v18 = vpop.f32.mrf.mxu2  ;;  %v664_v19 = vpop.f32.mrf.mxu3 }
  0xd5   : > { %903 = vst [vmem:[%s1511_s17 + $0xb0] sm:$0xff] %v839_v17  ;;  %v625_v20 = vadd.f32 %v1505_v40, %v624_v18  ;;  %v665_v21 = vadd.f32 %v1505_v40, %v664_v19  ;;  %v546_v22 = vpop.f32.mrf.mxu0  ;;  %v586_v23 = vpop.f32.mrf.mxu1 }
  0xd6   : > { %v547_v24 = vadd.f32 %v1505_v40, %v546_v22  ;;  %v587_v25 = vadd.f32 %v1505_v40, %v586_v23 }
  0xd7   : > { %vm727_vm13 = vcmp.ge.f32.partialorder %v625_v20, 0.0  ;;  %v791_v26 = vmul.f32 0.01, %v625_v20  ;;  %vm743_vm14 = vcmp.ge.f32.partialorder %v665_v21, 0.0  ;;  %v807_v27 = vmul.f32 0.01, %v665_v21 }
  0xd8   : > { %vm696_vm15 = vcmp.ge.f32.partialorder %v547_v24, 0.0  ;;  %v760_v28 = vmul.f32 0.01, %v547_v24  ;;  %vm712_vm0 = vcmp.ge.f32.partialorder %v587_v25, 0.0  ;;  %v776_v29 = vmul.f32 0.01, %v587_v25 }
  0xd9   : > { %v855_v30 = vsel %vm727_vm13, %v625_v20, %v791_v26  ;;  %v871_v31 = vsel %vm743_vm14, %v665_v21, %v807_v27 }
  0xda   : > { %919 = vst [vmem:[%s1511_s17 + $0x130] sm:$0xff] %v855_v30  ;;  %v824_v32 = vsel %vm696_vm15, %v547_v24, %v760_v28  ;;  %v840_v33 = vsel %vm712_vm0, %v587_v25, %v776_v29 }
  0xdb   : > { %935 = vst [vmem:[%s1511_s17 + $0x1b0] sm:$0xff] %v871_v31 }
  0xdc   : > { %888 = vst [vmem:[%s1511_s17 + $0x38] sm:$0xff] %v824_v32  ;;  %v626_v34 = vpop.f32.mrf.mxu2  ;;  %v666_v35 = vpop.f32.mrf.mxu3 }
  0xdd   : > { %904 = vst [vmem:[%s1511_s17 + $0xb8] sm:$0xff] %v840_v33  ;;  %v627_v36 = vadd.f32 %v1505_v40, %v626_v34  ;;  %v667_v37 = vadd.f32 %v1505_v40, %v666_v35  ;;  %v549_v38 = vpop.f32.mrf.mxu0  ;;  %v589_v39 = vpop.f32.mrf.mxu1 }
  0xde   : > { %v550_v41 = vadd.f32 %v1505_v40, %v549_v38  ;;  %v590_v42 = vadd.f32 %v1505_v40, %v589_v39 }
  0xdf   : > { %vm728_vm1 = vcmp.ge.f32.partialorder %v627_v36, 0.0  ;;  %v792_v43 = vmul.f32 0.01, %v627_v36  ;;  %vm744_vm2 = vcmp.ge.f32.partialorder %v667_v37, 0.0  ;;  %v808_v44 = vmul.f32 0.01, %v667_v37 }
  0xe0   : > { %vm697_vm3 = vcmp.ge.f32.partialorder %v550_v41, 0.0  ;;  %v761_v45 = vmul.f32 0.01, %v550_v41  ;;  %vm713_vm4 = vcmp.ge.f32.partialorder %v590_v42, 0.0  ;;  %v777_v46 = vmul.f32 0.01, %v590_v42 }
  0xe1   : > { %v856_v47 = vsel %vm728_vm1, %v627_v36, %v792_v43  ;;  %v872_v48 = vsel %vm744_vm2, %v667_v37, %v808_v44 }
  0xe2   : > { %920 = vst [vmem:[%s1511_s17 + $0x138] sm:$0xff] %v856_v47  ;;  %v825_v49 = vsel %vm697_vm3, %v550_v41, %v761_v45  ;;  %v841_v50 = vsel %vm713_vm4, %v590_v42, %v777_v46 }
  0xe3   : > { %936 = vst [vmem:[%s1511_s17 + $0x1b8] sm:$0xff] %v872_v48 }
  0xe4   : > { %889 = vst [vmem:[%s1511_s17 + $0x40] sm:$0xff] %v825_v49  ;;  %v629_v51 = vpop.f32.mrf.mxu2  ;;  %v669_v52 = vpop.f32.mrf.mxu3 }
  0xe5   : > { %905 = vst [vmem:[%s1511_s17 + $0xc0] sm:$0xff] %v841_v50  ;;  %v630_v53 = vadd.f32 %v1505_v40, %v629_v51  ;;  %v670_v54 = vadd.f32 %v1505_v40, %v669_v52  ;;  %v551_v55 = vpop.f32.mrf.mxu0  ;;  %v591_v56 = vpop.f32.mrf.mxu1 }
  0xe6   : > { %v552_v57 = vadd.f32 %v1505_v40, %v551_v55  ;;  %v592_v58 = vadd.f32 %v1505_v40, %v591_v56 }
  0xe7   : > { %vm729_vm5 = vcmp.ge.f32.partialorder %v630_v53, 0.0  ;;  %v793_v59 = vmul.f32 0.01, %v630_v53  ;;  %vm745_vm6 = vcmp.ge.f32.partialorder %v670_v54, 0.0  ;;  %v809_v60 = vmul.f32 0.01, %v670_v54 }
  0xe8   : > { %vm698_vm7 = vcmp.ge.f32.partialorder %v552_v57, 0.0  ;;  %v762_v61 = vmul.f32 0.01, %v552_v57  ;;  %vm714_vm8 = vcmp.ge.f32.partialorder %v592_v58, 0.0  ;;  %v778_v62 = vmul.f32 0.01, %v592_v58 }
  0xe9   : > { %v857_v63 = vsel %vm729_vm5, %v630_v53, %v793_v59  ;;  %v873_v0 = vsel %vm745_vm6, %v670_v54, %v809_v60 }
  0xea   : > { %921 = vst [vmem:[%s1511_s17 + $0x140] sm:$0xff] %v857_v63  ;;  %v826_v1 = vsel %vm698_vm7, %v552_v57, %v762_v61  ;;  %v842_v2 = vsel %vm714_vm8, %v592_v58, %v778_v62 }
  0xeb   : > { %937 = vst [vmem:[%s1511_s17 + $0x1c0] sm:$0xff] %v873_v0 }
  0xec   : > { %890 = vst [vmem:[%s1511_s17 + $0x48] sm:$0xff] %v826_v1  ;;  %v631_v3 = vpop.f32.mrf.mxu2  ;;  %v671_v4 = vpop.f32.mrf.mxu3 }
  0xed   : > { %906 = vst [vmem:[%s1511_s17 + $0xc8] sm:$0xff] %v842_v2  ;;  %v632_v5 = vadd.f32 %v1505_v40, %v631_v3  ;;  %v672_v6 = vadd.f32 %v1505_v40, %v671_v4  ;;  %v554_v7 = vpop.f32.mrf.mxu0  ;;  %v594_v8 = vpop.f32.mrf.mxu1 }
  0xee   : > { %v555_v9 = vadd.f32 %v1505_v40, %v554_v7  ;;  %v595_v10 = vadd.f32 %v1505_v40, %v594_v8 }
  0xef   : > { %vm730_vm9 = vcmp.ge.f32.partialorder %v632_v5, 0.0  ;;  %v794_v11 = vmul.f32 0.01, %v632_v5  ;;  %vm746_vm10 = vcmp.ge.f32.partialorder %v672_v6, 0.0  ;;  %v810_v12 = vmul.f32 0.01, %v672_v6 }
  0xf0   : > { %vm699_vm11 = vcmp.ge.f32.partialorder %v555_v9, 0.0  ;;  %v763_v13 = vmul.f32 0.01, %v555_v9  ;;  %vm715_vm12 = vcmp.ge.f32.partialorder %v595_v10, 0.0  ;;  %v779_v14 = vmul.f32 0.01, %v595_v10 }
  0xf1   : > { %v858_v15 = vsel %vm730_vm9, %v632_v5, %v794_v11  ;;  %v874_v16 = vsel %vm746_vm10, %v672_v6, %v810_v12 }
  0xf2   : > { %922 = vst [vmem:[%s1511_s17 + $0x148] sm:$0xff] %v858_v15  ;;  %v827_v17 = vsel %vm699_vm11, %v555_v9, %v763_v13  ;;  %v843_v18 = vsel %vm715_vm12, %v595_v10, %v779_v14 }
  0xf3   : > { %938 = vst [vmem:[%s1511_s17 + $0x1c8] sm:$0xff] %v874_v16 }
  0xf4   : > { %891 = vst [vmem:[%s1511_s17 + $0x50] sm:$0xff] %v827_v17  ;;  %v634_v19 = vpop.f32.mrf.mxu2  ;;  %v674_v20 = vpop.f32.mrf.mxu3 }
  0xf5   : > { %907 = vst [vmem:[%s1511_s17 + $0xd0] sm:$0xff] %v843_v18  ;;  %v635_v21 = vadd.f32 %v1505_v40, %v634_v19  ;;  %v675_v22 = vadd.f32 %v1505_v40, %v674_v20  ;;  %v556_v23 = vpop.f32.mrf.mxu0  ;;  %v596_v24 = vpop.f32.mrf.mxu1 }
  0xf6   : > { %v557_v25 = vadd.f32 %v1505_v40, %v556_v23  ;;  %v597_v26 = vadd.f32 %v1505_v40, %v596_v24 }
  0xf7   : > { %vm731_vm13 = vcmp.ge.f32.partialorder %v635_v21, 0.0  ;;  %v795_v27 = vmul.f32 0.01, %v635_v21  ;;  %vm747_vm14 = vcmp.ge.f32.partialorder %v675_v22, 0.0  ;;  %v811_v28 = vmul.f32 0.01, %v675_v22 }
  0xf8   : > { %vm700_vm15 = vcmp.ge.f32.partialorder %v557_v25, 0.0  ;;  %v764_v29 = vmul.f32 0.01, %v557_v25  ;;  %vm716_vm0 = vcmp.ge.f32.partialorder %v597_v26, 0.0  ;;  %v780_v30 = vmul.f32 0.01, %v597_v26 }
  0xf9   : > { %v859_v31 = vsel %vm731_vm13, %v635_v21, %v795_v27  ;;  %v875_v32 = vsel %vm747_vm14, %v675_v22, %v811_v28 }
  0xfa   : > { %923 = vst [vmem:[%s1511_s17 + $0x150] sm:$0xff] %v859_v31  ;;  %v828_v33 = vsel %vm700_vm15, %v557_v25, %v764_v29  ;;  %v844_v34 = vsel %vm716_vm0, %v597_v26, %v780_v30 }
  0xfb   : > { %939 = vst [vmem:[%s1511_s17 + $0x1d0] sm:$0xff] %v875_v32 }
  0xfc   : > { %892 = vst [vmem:[%s1511_s17 + $0x58] sm:$0xff] %v828_v33  ;;  %v636_v35 = vpop.f32.mrf.mxu2  ;;  %v676_v36 = vpop.f32.mrf.mxu3 }
  0xfd   : > { %908 = vst [vmem:[%s1511_s17 + $0xd8] sm:$0xff] %v844_v34  ;;  %v637_v37 = vadd.f32 %v1505_v40, %v636_v35  ;;  %v677_v38 = vadd.f32 %v1505_v40, %v676_v36  ;;  %v559_v39 = vpop.f32.mrf.mxu0  ;;  %v599_v41 = vpop.f32.mrf.mxu1 }
  0xfe   : > { %v560_v42 = vadd.f32 %v1505_v40, %v559_v39  ;;  %v600_v43 = vadd.f32 %v1505_v40, %v599_v41 }
  0xff   : > { %vm732_vm1 = vcmp.ge.f32.partialorder %v637_v37, 0.0  ;;  %v796_v44 = vmul.f32 0.01, %v637_v37  ;;  %vm748_vm2 = vcmp.ge.f32.partialorder %v677_v38, 0.0  ;;  %v812_v45 = vmul.f32 0.01, %v677_v38 }
 0x100   : > { %vm701_vm3 = vcmp.ge.f32.partialorder %v560_v42, 0.0  ;;  %v765_v46 = vmul.f32 0.01, %v560_v42  ;;  %vm717_vm4 = vcmp.ge.f32.partialorder %v600_v43, 0.0  ;;  %v781_v47 = vmul.f32 0.01, %v600_v43 }
 0x101   : > { %v860_v48 = vsel %vm732_vm1, %v637_v37, %v796_v44  ;;  %v876_v49 = vsel %vm748_vm2, %v677_v38, %v812_v45 }
 0x102   : > { %924 = vst [vmem:[%s1511_s17 + $0x158] sm:$0xff] %v860_v48  ;;  %v829_v50 = vsel %vm701_vm3, %v560_v42, %v765_v46  ;;  %v845_v51 = vsel %vm717_vm4, %v600_v43, %v781_v47 }
 0x103   : > { %940 = vst [vmem:[%s1511_s17 + $0x1d8] sm:$0xff] %v876_v49 }
 0x104   : > { %893 = vst [vmem:[%s1511_s17 + $0x60] sm:$0xff] %v829_v50  ;;  %v639_v52 = vpop.f32.mrf.mxu2  ;;  %v679_v53 = vpop.f32.mrf.mxu3 }
 0x105   : > { %909 = vst [vmem:[%s1511_s17 + $0xe0] sm:$0xff] %v845_v51  ;;  %v640_v54 = vadd.f32 %v1505_v40, %v639_v52  ;;  %v680_v55 = vadd.f32 %v1505_v40, %v679_v53  ;;  %v561_v56 = vpop.f32.mrf.mxu0  ;;  %v601_v57 = vpop.f32.mrf.mxu1 }
 0x106   : > { %v562_v58 = vadd.f32 %v1505_v40, %v561_v56  ;;  %v602_v59 = vadd.f32 %v1505_v40, %v601_v57 }
 0x107   : > { %vm733_vm5 = vcmp.ge.f32.partialorder %v640_v54, 0.0  ;;  %v797_v60 = vmul.f32 0.01, %v640_v54  ;;  %vm749_vm6 = vcmp.ge.f32.partialorder %v680_v55, 0.0  ;;  %v813_v61 = vmul.f32 0.01, %v680_v55 }
 0x108   : > { %vm702_vm7 = vcmp.ge.f32.partialorder %v562_v58, 0.0  ;;  %v766_v62 = vmul.f32 0.01, %v562_v58  ;;  %vm718_vm8 = vcmp.ge.f32.partialorder %v602_v59, 0.0  ;;  %v782_v63 = vmul.f32 0.01, %v602_v59 }
 0x109   : > { %v861_v0 = vsel %vm733_vm5, %v640_v54, %v797_v60  ;;  %v877_v1 = vsel %vm749_vm6, %v680_v55, %v813_v61 }
 0x10a   : > { %925 = vst [vmem:[%s1511_s17 + $0x160] sm:$0xff] %v861_v0  ;;  %v830_v2 = vsel %vm702_vm7, %v562_v58, %v766_v62  ;;  %v846_v3 = vsel %vm718_vm8, %v602_v59, %v782_v63 }
 0x10b   : > { %941 = vst [vmem:[%s1511_s17 + $0x1e0] sm:$0xff] %v877_v1 }
 0x10c   : > { %894 = vst [vmem:[%s1511_s17 + $0x68] sm:$0xff] %v830_v2  ;;  %v641_v4 = vpop.f32.mrf.mxu2  ;;  %v681_v5 = vpop.f32.mrf.mxu3 }
 0x10d   : > { %910 = vst [vmem:[%s1511_s17 + $0xe8] sm:$0xff] %v846_v3  ;;  %v642_v6 = vadd.f32 %v1505_v40, %v641_v4  ;;  %v682_v7 = vadd.f32 %v1505_v40, %v681_v5  ;;  %v564_v8 = vpop.f32.mrf.mxu0  ;;  %v604_v9 = vpop.f32.mrf.mxu1 }
 0x10e   : > { %v565_v10 = vadd.f32 %v1505_v40, %v564_v8  ;;  %v605_v11 = vadd.f32 %v1505_v40, %v604_v9 }
 0x10f   : > { %vm734_vm9 = vcmp.ge.f32.partialorder %v642_v6, 0.0  ;;  %v798_v12 = vmul.f32 0.01, %v642_v6  ;;  %vm750_vm10 = vcmp.ge.f32.partialorder %v682_v7, 0.0  ;;  %v814_v13 = vmul.f32 0.01, %v682_v7 }
 0x110   : > { %vm703_vm11 = vcmp.ge.f32.partialorder %v565_v10, 0.0  ;;  %v767_v14 = vmul.f32 0.01, %v565_v10  ;;  %vm719_vm12 = vcmp.ge.f32.partialorder %v605_v11, 0.0  ;;  %v783_v15 = vmul.f32 0.01, %v605_v11 }
 0x111   : > { %v862_v16 = vsel %vm734_vm9, %v642_v6, %v798_v12  ;;  %v878_v17 = vsel %vm750_vm10, %v682_v7, %v814_v13 }
 0x112   : > { %926 = vst [vmem:[%s1511_s17 + $0x168] sm:$0xff] %v862_v16  ;;  %v831_v18 = vsel %vm703_vm11, %v565_v10, %v767_v14  ;;  %v847_v19 = vsel %vm719_vm12, %v605_v11, %v783_v15 }
 0x113   : > { %942 = vst [vmem:[%s1511_s17 + $0x1e8] sm:$0xff] %v878_v17 }
 0x114   : > { %895 = vst [vmem:[%s1511_s17 + $0x70] sm:$0xff] %v831_v18  ;;  %v644_v20 = vpop.f32.mrf.mxu2  ;;  %v684_v21 = vpop.f32.mrf.mxu3 }
 0x115   : > { %911 = vst [vmem:[%s1511_s17 + $0xf0] sm:$0xff] %v847_v19  ;;  %v645_v22 = vadd.f32 %v1505_v40, %v644_v20  ;;  %v685_v23 = vadd.f32 %v1505_v40, %v684_v21  ;;  %v566_v24 = vpop.f32.mrf.mxu0  ;;  %v606_v25 = vpop.f32.mrf.mxu1 }
 0x116   : > { %v567_v26 = vadd.f32 %v1505_v40, %v566_v24  ;;  %v607_v27 = vadd.f32 %v1505_v40, %v606_v25 }
 0x117   : > { %vm735_vm13 = vcmp.ge.f32.partialorder %v645_v22, 0.0  ;;  %v799_v28 = vmul.f32 0.01, %v645_v22  ;;  %vm751_vm14 = vcmp.ge.f32.partialorder %v685_v23, 0.0  ;;  %v815_v29 = vmul.f32 0.01, %v685_v23 }
 0x118   : > { %vm704_vm15 = vcmp.ge.f32.partialorder %v567_v26, 0.0  ;;  %v768_v30 = vmul.f32 0.01, %v567_v26  ;;  %vm720_vm0 = vcmp.ge.f32.partialorder %v607_v27, 0.0  ;;  %v784_v31 = vmul.f32 0.01, %v607_v27 }
 0x119   : > { %v863_v32 = vsel %vm735_vm13, %v645_v22, %v799_v28  ;;  %v879_v33 = vsel %vm751_vm14, %v685_v23, %v815_v29 }
 0x11a   : > { %927 = vst [vmem:[%s1511_s17 + $0x170] sm:$0xff] %v863_v32  ;;  %v832_v34 = vsel %vm704_vm15, %v567_v26, %v768_v30  ;;  %v848_v35 = vsel %vm720_vm0, %v607_v27, %v784_v31 }
 0x11b   : > { %943 = vst [vmem:[%s1511_s17 + $0x1f0] sm:$0xff] %v879_v33 }
 0x11c   : > { %896 = vst [vmem:[%s1511_s17 + $0x78] sm:$0xff] %v832_v34  ;;  %v646_v36 = vpop.f32.mrf.mxu2  ;;  %v686_v37 = vpop.f32.mrf.mxu3 }
 0x11d   : > { %912 = vst [vmem:[%s1511_s17 + $0xf8] sm:$0xff] %v848_v35  ;;  %v647_v38 = vadd.f32 %v1505_v40, %v646_v36  ;;  %v687_v39 = vadd.f32 %v1505_v40, %v686_v37 }
 0x11f   : > { %vm736_vm1 = vcmp.ge.f32.partialorder %v647_v38, 0.0  ;;  %v800_v41 = vmul.f32 0.01, %v647_v38  ;;  %vm752_vm2 = vcmp.ge.f32.partialorder %v687_v39, 0.0  ;;  %v816_v42 = vmul.f32 0.01, %v687_v39 }
 0x121   : > { %v864_v43 = vsel %vm736_vm1, %v647_v38, %v800_v41  ;;  %v880_v44 = vsel %vm752_vm2, %v687_v39, %v816_v42 }
 0x122   : > { %928 = vst [vmem:[%s1511_s17 + $0x178] sm:$0xff] %v864_v43 }
 0x123   : > { %944 = vst [vmem:[%s1511_s17 + $0x1f8] sm:$0xff] %v880_v44 }
 0x124   : > { %1314 = shalt.err (!%p1311_p3)
}
 0x125   : > { %s1352_s8 = smov 128   ;;  %s1353_s9 = smov 8  }
 0x126   : > { %1244 = dma.vmem_to_hbm [thread:$0]  (%p1412_p5), %s959_s25, 8192, %s961_s26, %s946_s27, %s1352_s8, %s1352_s8, %s1353_s9  }
 0x127 PF: > { %p1250_p4 = scmp.ge.s32.totalorder %s1349_s15, 2  ;;  %s975_s10 = sand.u32 1, %s1337_s12  }
 0x128   : > { %s976_s11 = scalar_lea.sflag [#allocation3], %s975_s10 }
 0x129   : > { %p1247_p7 = pnand %p1250_p4, %p1416_p6 }
 0x12b   : > { %p1248_p8 = pneg %p1247_p7 }
 0x12d   : > { %1332 = dma.done.wait (%p1248_p8), %s976_s11, 8192  }
 0x12e   : > { %1334 = vsyncadd (%p1248_p8), %s976_s11, 4294959104  ;;  %p13_p9 = scmp.ge.s32.totalorder %s1399_s18, 5   ;;  %s1679_s12 = smov %s1341_s13 }
 0x12f   : > { %s1680_s13 = smov %s1345_s14  ;;  %s1681_s14 = smov %s1410_s21 }
 0x130   : > { %s1682_s15 = smov %s1399_s18  ;;  %15 = sbr.rel (!%p13_p9) target bundleno = 3 (0x3), region = 67 }
 0x135   :  { %982 = vsyncpa [#allocation3], 1 }
 0x136   :  { %984 = vsyncpa [#allocation3 + $0x1], 1 }

</bundles_post_ra>
